<compile_context>
chip_gen: v7x
topology: tpu7x:2x2x1
jax: 0.10.0
libtpu: 0.0.40
codegen_flags: <defaults>
</compile_context>

<pallas_src>
import functools

import jax
import jax.numpy as jnp
import numpy as np
from jax.experimental import pallas as pl
from jax.experimental.pallas import tpu as pltpu


# ----------------------------------------------------------------------------
# Fused LSTM kernel: one grid point per sequence-set (0 = contexts, 1 = responses).
# Whole sequence in VMEM; time loop internal; returns last valid hidden state.
# ----------------------------------------------------------------------------
def lstm_kernel(len_ref, x_ref, wx_ref, wh_ref, b_ref, out_ref, xw_scr):
    TB, E = x_ref.shape
    B, H = out_ref.shape
    T = TB // B

    # Hoisted input projection: ONE (T*B, E) @ (E, 4H) MXU matmul + bias,
    # removed from the serial recurrence.
    xw_scr[...] = (
        jnp.dot(x_ref[...], wx_ref[...], preferred_element_type=jnp.float32)
        + b_ref[...])

    wh = wh_ref[...]                    # (H, 4H), hoisted out of the loop
    w_dtype = wh.dtype
    lengths = len_ref[...]              # (B, 1) int32

    def step(t, carry):
        h, c = carry
        row0 = pl.multiple_of(t * B, B)
        # Per-step work on the critical path: a single (B,H) @ (H,4H) matmul.
        gates = xw_scr[pl.ds(row0, B), :] + jnp.dot(
            h.astype(w_dtype), wh, preferred_element_type=jnp.float32)  # (B, 4H)

        # One sigmoid pass + one tanh pass over the full lane-dense (B, 4H) tile,
        # then slice (gate order i|f|g|o matches torch.nn.LSTM).
        sg = jax.nn.sigmoid(gates)
        tg = jnp.tanh(gates)
        i_g = sg[:, 0 * H:1 * H]
        f_g = sg[:, 1 * H:2 * H]
        g_g = tg[:, 2 * H:3 * H]
        o_g = sg[:, 3 * H:4 * H]

        c_new = f_g * c + i_g * g_g
        h_new = o_g * jnp.tanh(c_new)

        # Freeze state once past each sequence's length (pack_padded semantics).
        valid = t < lengths             # (B, 1) bool
        return (jnp.where(valid, h_new, h), jnp.where(valid, c_new, c))

    h0 = jnp.zeros((B, H), jnp.float32)
    c0 = jnp.zeros((B, H), jnp.float32)
    h_last, _ = jax.lax.fori_loop(0, T, step, (h0, c0), unroll=True)
    out_ref[...] = h_last


def lstm_last_hidden_fused(x, lengths, wx, wh, b, *, seq_len):
    """x: (2, T*B, E) time-major rows (row t*B + b); lengths: (2, B, 1) int32;
    wx: (E, 4H); wh: (H, 4H); b: (1, 4H) f32.  Returns (2, B, H) f32."""
    G, TB, E = x.shape
    B = TB // seq_len
    H = wh.shape[0]
    return pl.pallas_call(
        lstm_kernel,
        out_shape=jax.ShapeDtypeStruct((G, B, H), jnp.float32),
        grid_spec=pltpu.PrefetchScalarGridSpec(
            num_scalar_prefetch=0,
            grid=(G,),
            in_specs=[
                pl.BlockSpec((pl.Squeezed(), B, 1), lambda g: (g, 0, 0)),   # lengths
                pl.BlockSpec((pl.Squeezed(), TB, E), lambda g: (g, 0, 0)),  # x
                pl.BlockSpec((E, 4 * H), lambda g: (0, 0)),                 # wx
                pl.BlockSpec((H, 4 * H), lambda g: (0, 0)),                 # wh
                pl.BlockSpec((1, 4 * H), lambda g: (0, 0)),                 # bias
            ],
            out_specs=pl.BlockSpec((pl.Squeezed(), B, H), lambda g: (g, 0, 0)),
            scratch_shapes=[pltpu.VMEM((TB, 4 * H), jnp.float32)],          # x@Wx+b
        ),
        # Leading axis of size 2 (contexts vs responses) is independent ->
        # megacore-parallel on v7x, harmless on single-TC v5e/v6e.
        compiler_params=pltpu.CompilerParams(
            dimension_semantics=("parallel",)),
    )(lengths, x, wx, wh, b)


# ----------------------------------------------------------------------------
# Full forward.  Embedding lookup, csi/rsi scatter reorder and the tiny bilinear
# score + sigmoid are plain-XLA glue (score kernel dropped per perf review).
# ----------------------------------------------------------------------------
@functools.partial(jax.jit, static_argnames=("compute_dtype",))
def text_lstm_encoder_forward(params, contexts, contexts_len, csi,
                              responses, responses_len, rsi,
                              compute_dtype=jnp.float32):
    emb = params["embedding"]                              # (V, E)
    wx = params["wx"].astype(compute_dtype)                # (E, 4H)
    wh = params["wh"].astype(compute_dtype)                # (H, 4H)
    b = params["b"]                                        # (1, 4H) f32
    H = params["wh"].shape[0]

    B, T = contexts.shape
    E = emb.shape[1]

    # Stack contexts/responses -> (2, B, T); embed; go time-major and flatten
    # (t, b) -> row t*B + b so the kernel can slice per-step rows contiguously.
    tok = jnp.stack([contexts, responses], axis=0)         # (2, B, T)
    x = emb[tok]                                           # (2, B, T, E)
    x = jnp.transpose(x, (0, 2, 1, 3)).reshape(2, T * B, E)
    x = x.astype(compute_dtype)

    lens = jnp.stack([contexts_len, responses_len], axis=0)
    lens = lens.reshape(2, B, 1).astype(jnp.int32)

    h_all = lstm_last_hidden_fused(x, lens, wx, wh, b, seq_len=T)  # (2, B, H)
    clh_sorted, rlh_sorted = h_all[0], h_all[1]

    # clh[csi[i]] = contexts_last_hidden[i]  (reorder back to original order)
    clh = jnp.zeros((B, H), jnp.float32).at[csi].set(clh_sorted)
    rlh = jnp.zeros((B, H), jnp.float32).at[rsi].set(rlh_sorted)

    # Bilinear score + sigmoid (trivially small -> XLA, no extra kernel launch).
    score = jnp.sum((clh @ params["M"]) * rlh, axis=-1, keepdims=True)  # (B, 1)
    return jax.nn.sigmoid(score)


# ----------------------------------------------------------------------------
# Pure-JAX reference for correctness check.
# ----------------------------------------------------------------------------
def lstm_ref(x_bt, lengths, wx, wh, b):
    B, T, E = x_bt.shape
    H = wh.shape[0]
    h = jnp.zeros((B, H), jnp.float32)
    c = jnp.zeros((B, H), jnp.float32)
    for t in range(T):
        gates = x_bt[:, t, :] @ wx + h @ wh + b
        i_g = jax.nn.sigmoid(gates[:, :H])
        f_g = jax.nn.sigmoid(gates[:, H:2 * H])
        g_g = jnp.tanh(gates[:, 2 * H:3 * H])
        o_g = jax.nn.sigmoid(gates[:, 3 * H:])
        c_new = f_g * c + i_g * g_g
        h_new = o_g * jnp.tanh(c_new)
        m = (t < lengths)[:, None]
        h = jnp.where(m, h_new, h)
        c = jnp.where(m, c_new, c)
    return h


def forward_ref(params, contexts, contexts_len, csi, responses, responses_len, rsi):
    emb = params["embedding"]
    wx, wh, b = params["wx"], params["wh"], params["b"]
    clh_s = lstm_ref(emb[contexts], contexts_len, wx, wh, b)
    rlh_s = lstm_ref(emb[responses], responses_len, wx, wh, b)
    B, H = clh_s.shape
    clh = jnp.zeros((B, H), jnp.float32).at[csi].set(clh_s)
    rlh = jnp.zeros((B, H), jnp.float32).at[rsi].set(rlh_s)
    score = jnp.sum((clh @ params["M"]) * rlh, axis=-1, keepdims=True)
    return jax.nn.sigmoid(score)


# ----------------------------------------------------------------------------
if __name__ == "__main__":
    # Small shapes consistent with the module.
    VOCAB = 50
    EMB = 16       # emb_size
    HID = 32       # config.hidden_size
    B = 8          # batch
    T = 10         # sequence length

    key = jax.random.PRNGKey(0)
    k_emb, k_wx, k_wh, k_b, k_M, k_ctx, k_rsp, k_cl, k_rl, k_p1, k_p2 = \
        jax.random.split(key, 11)

    # Deterministic synthetic parameters (shapes per module __init__).
    xavier_std = float(np.sqrt(2.0 / (HID + HID)))
    params = {
        "embedding": jax.random.normal(k_emb, (VOCAB, EMB), jnp.float32) * 0.1,
        # W_ih^T : (E, 4H), W_hh^T : (H, 4H), combined bias (b_ih + b_hh): (1, 4H)
        "wx": jax.random.normal(k_wx, (EMB, 4 * HID), jnp.float32) * 0.1,
        "wh": jax.random.normal(k_wh, (HID, 4 * HID), jnp.float32) * 0.1,
        "b": jax.random.normal(k_b, (1, 4 * HID), jnp.float32) * 0.1,
        "M": jax.random.normal(k_M, (HID, HID), jnp.float32) * xavier_std,
    }

    # Inputs: token ids, descending-sorted lengths, and the sort-index maps.
    contexts = jax.random.randint(k_ctx, (B, T), 0, VOCAB, dtype=jnp.int32)
    responses = jax.random.randint(k_rsp, (B, T), 0, VOCAB, dtype=jnp.int32)
    contexts_len = jnp.sort(
        jax.random.randint(k_cl, (B,), 1, T + 1, dtype=jnp.int32))[::-1]
    responses_len = jnp.sort(
        jax.random.randint(k_rl, (B,), 1, T + 1, dtype=jnp.int32))[::-1]
    csi = jax.random.permutation(k_p1, B).astype(jnp.int32)
    rsi = jax.random.permutation(k_p2, B).astype(jnp.int32)

    probs_ref = forward_ref(
        params, contexts, contexts_len, csi, responses, responses_len, rsi)
    probs_ref = jax.block_until_ready(probs_ref)

    # f32 path: matches the PyTorch module's numerics.
    probs_f32 = text_lstm_encoder_forward(
        params, contexts, contexts_len, csi, responses, responses_len, rsi,
        compute_dtype=jnp.float32)
    probs_f32 = jax.block_until_ready(probs_f32)
    assert probs_f32.shape == (B, 1)
    np.testing.assert_allclose(np.asarray(probs_f32), np.asarray(probs_ref),
                               rtol=1e-4, atol=1e-4)

    # bf16 matmul-operand path (f32 accumulation / state): v6e / v7x perf option.
    probs_bf16 = text_lstm_encoder_forward(
        params, contexts, contexts_len, csi, responses, responses_len, rsi,
        compute_dtype=jnp.bfloat16)
    probs_bf16 = jax.block_until_ready(probs_bf16)
    np.testing.assert_allclose(np.asarray(probs_bf16), np.asarray(probs_ref),
                               rtol=2e-2, atol=2e-2)

    print("KERNEL_OK")
</pallas_src>

<mosaic_0001>
module attributes {stable_mosaic.version = 11 : i64} {
  func.func @lstm_kernel(%arg0: i32, %arg1: memref<1x8x1xi32, #tpu.memory_space<vmem>>, %arg2: memref<1x80x16xf32, #tpu.memory_space<vmem>>, %arg3: memref<16x128xf32, #tpu.memory_space<vmem>>, %arg4: memref<32x128xf32, #tpu.memory_space<vmem>>, %arg5: memref<1x128xf32, #tpu.memory_space<vmem>>, %arg6: memref<1x8x32xf32, #tpu.memory_space<vmem>>, %arg7: memref<80x128xf32, #tpu.memory_space<vmem>>) attributes {dimension_semantics = [#tpu.dimension_semantics<parallel>], iteration_bounds = array<i64: 2>, scalar_prefetch = 0 : i64, scratch_operands = 1 : i64, tpu.core_type = #tpu.core_type<tc>, window_params = [{transform_indices = @transform_0, window_bounds = array<i64: 1, 8, 1>}, {transform_indices = @transform_1, window_bounds = array<i64: 1, 80, 16>}, {pipeline_mode = #tpu.pipeline_mode<synchronous>, transform_indices = @transform_2, window_bounds = array<i64: 16, 128>}, {pipeline_mode = #tpu.pipeline_mode<synchronous>, transform_indices = @transform_3, window_bounds = array<i64: 32, 128>}, {pipeline_mode = #tpu.pipeline_mode<synchronous>, transform_indices = @transform_4, window_bounds = array<i64: 1, 128>}, {transform_indices = @transform_5, window_bounds = array<i64: 1, 8, 32>}]} {
    %c0 = arith.constant 0 : index
    %c0_0 = arith.constant 0 : index
    %c0_1 = arith.constant 0 : index
    %0 = vector.load %arg2[%c0, %c0_0, %c0_1] : memref<1x80x16xf32, #tpu.memory_space<vmem>>, vector<1x80x16xf32>
    %1 = vector.shape_cast %0 : vector<1x80x16xf32> to vector<80x16xf32>
    %c0_2 = arith.constant 0 : index
    %c0_3 = arith.constant 0 : index
    %2 = vector.load %arg3[%c0_2, %c0_3] : memref<16x128xf32, #tpu.memory_space<vmem>>, vector<16x128xf32>
    %cst = arith.constant dense<0.000000e+00> : vector<80x128xf32>
    %3 = tpu.matmul %1, %2, %cst {dimension_numbers = #tpu.dot_dimension_numbers<[1], [0], [0], [1], [0, 0, 1, 1], [], []>} : vector<80x16xf32>, vector<16x128xf32>, vector<80x128xf32> -> vector<80x128xf32>
    %c0_4 = arith.constant 0 : index
    %c0_5 = arith.constant 0 : index
    %4 = vector.load %arg5[%c0_4, %c0_5] : memref<1x128xf32, #tpu.memory_space<vmem>>, vector<1x128xf32>
    %5 = vector.broadcast %4 : vector<1x128xf32> to vector<80x128xf32>
    %6 = arith.addf %3, %5 : vector<80x128xf32>
    %c0_6 = arith.constant 0 : index
    %c0_7 = arith.constant 0 : index
    %7 = vector.load %arg7[%c0_6, %c0_7] : memref<80x128xf32, #tpu.memory_space<vmem>>, vector<80x128xf32>
    tpu.vector_store %arg7[%c0_6, %c0_7], %6 {strides = array<i32>} : memref<80x128xf32, #tpu.memory_space<vmem>>, vector<80x128xf32>,
    %c0_8 = arith.constant 0 : index
    %c0_9 = arith.constant 0 : index
    %8 = vector.load %arg4[%c0_8, %c0_9] : memref<32x128xf32, #tpu.memory_space<vmem>>, vector<32x128xf32>
    %c0_10 = arith.constant 0 : index
    %c0_11 = arith.constant 0 : index
    %c0_12 = arith.constant 0 : index
    %9 = vector.load %arg1[%c0_10, %c0_11, %c0_12] : memref<1x8x1xi32, #tpu.memory_space<vmem>>, vector<1x8x1xi32>
    %10 = vector.shape_cast %9 : vector<1x8x1xi32> to vector<8x1xi32>
    %cst_13 = arith.constant 0.000000e+00 : f32
    %11 = vector.broadcast %cst_13 : f32 to vector<8x32xf32>
    %cst_14 = arith.constant 0.000000e+00 : f32
    %12 = vector.broadcast %cst_14 : f32 to vector<8x32xf32>
    %c0_i32 = arith.constant 0 : i32
    %c8_i32 = arith.constant 8 : i32
    %13 = arith.muli %c0_i32, %c8_i32 : i32
    %14 = tpu.assume_multiple %13, 8 : i32
    %15 = arith.index_cast %14 : i32 to index
    %c0_15 = arith.constant 0 : index
    %16 = vector.load %arg7[%15, %c0_15] : memref<80x128xf32, #tpu.memory_space<vmem>>, vector<8x128xf32>
    %cst_16 = arith.constant dense<0.000000e+00> : vector<8x128xf32>
    %17 = tpu.matmul %11, %8, %cst_16 {dimension_numbers = #tpu.dot_dimension_numbers<[1], [0], [0], [1], [0, 0, 1, 1], [], []>} : vector<8x32xf32>, vector<32x128xf32>, vector<8x128xf32> -> vector<8x128xf32>
    %18 = arith.addf %16, %17 : vector<8x128xf32>
    %19 = arith.negf %18 : vector<8x128xf32>
    %20 = math.exp %19 : vector<8x128xf32>
    %cst_17 = arith.constant 1.000000e+00 : f32
    %21 = vector.broadcast %cst_17 : f32 to vector<8x128xf32>
    %22 = arith.addf %21, %20 : vector<8x128xf32>
    %23 = arith.divf %21, %22 : vector<8x128xf32>
    %24 = math.tanh %18 : vector<8x128xf32>
    %25 = vector.extract_strided_slice %23 {offsets = [0, 0], sizes = [8, 32], strides = [1, 1]} : vector<8x128xf32> to vector<8x32xf32>
    %26 = vector.extract_strided_slice %23 {offsets = [0, 32], sizes = [8, 32], strides = [1, 1]} : vector<8x128xf32> to vector<8x32xf32>
    %27 = vector.extract_strided_slice %24 {offsets = [0, 64], sizes = [8, 32], strides = [1, 1]} : vector<8x128xf32> to vector<8x32xf32>
    %28 = vector.extract_strided_slice %23 {offsets = [0, 96], sizes = [8, 32], strides = [1, 1]} : vector<8x128xf32> to vector<8x32xf32>
    %29 = arith.mulf %26, %12 : vector<8x32xf32>
    %30 = arith.mulf %25, %27 : vector<8x32xf32>
    %31 = arith.addf %29, %30 : vector<8x32xf32>
    %32 = math.tanh %31 : vector<8x32xf32>
    %33 = arith.mulf %28, %32 : vector<8x32xf32>
    %34 = vector.broadcast %c0_i32 : i32 to vector<8x1xi32>
    %35 = arith.cmpi slt, %34, %10 : vector<8x1xi32>
    %36 = vector.shape_cast %35 : vector<8x1xi1> to vector<8x1xi1>
    %37 = vector.broadcast %36 : vector<8x1xi1> to vector<8x32xi1>
    %38 = arith.select %37, %33, %11 : vector<8x32xi1>, vector<8x32xf32>
    %39 = vector.shape_cast %35 : vector<8x1xi1> to vector<8x1xi1>
    %40 = vector.broadcast %39 : vector<8x1xi1> to vector<8x32xi1>
    %41 = arith.select %40, %31, %12 : vector<8x32xi1>, vector<8x32xf32>
    %c1_i32 = arith.constant 1 : i32
    %c8_i32_18 = arith.constant 8 : i32
    %42 = arith.muli %c1_i32, %c8_i32_18 : i32
    %43 = tpu.assume_multiple %42, 8 : i32
    %44 = arith.index_cast %43 : i32 to index
    %c0_19 = arith.constant 0 : index
    %45 = vector.load %arg7[%44, %c0_19] : memref<80x128xf32, #tpu.memory_space<vmem>>, vector<8x128xf32>
    %cst_20 = arith.constant dense<0.000000e+00> : vector<8x128xf32>
    %46 = tpu.matmul %38, %8, %cst_20 {dimension_numbers = #tpu.dot_dimension_numbers<[1], [0], [0], [1], [0, 0, 1, 1], [], []>} : vector<8x32xf32>, vector<32x128xf32>, vector<8x128xf32> -> vector<8x128xf32>
    %47 = arith.addf %45, %46 : vector<8x128xf32>
    %48 = arith.negf %47 : vector<8x128xf32>
    %49 = math.exp %48 : vector<8x128xf32>
    %cst_21 = arith.constant 1.000000e+00 : f32
    %50 = vector.broadcast %cst_21 : f32 to vector<8x128xf32>
    %51 = arith.addf %50, %49 : vector<8x128xf32>
    %52 = arith.divf %50, %51 : vector<8x128xf32>
    %53 = math.tanh %47 : vector<8x128xf32>
    %54 = vector.extract_strided_slice %52 {offsets = [0, 0], sizes = [8, 32], strides = [1, 1]} : vector<8x128xf32> to vector<8x32xf32>
    %55 = vector.extract_strided_slice %52 {offsets = [0, 32], sizes = [8, 32], strides = [1, 1]} : vector<8x128xf32> to vector<8x32xf32>
    %56 = vector.extract_strided_slice %53 {offsets = [0, 64], sizes = [8, 32], strides = [1, 1]} : vector<8x128xf32> to vector<8x32xf32>
    %57 = vector.extract_strided_slice %52 {offsets = [0, 96], sizes = [8, 32], strides = [1, 1]} : vector<8x128xf32> to vector<8x32xf32>
    %58 = arith.mulf %55, %41 : vector<8x32xf32>
    %59 = arith.mulf %54, %56 : vector<8x32xf32>
    %60 = arith.addf %58, %59 : vector<8x32xf32>
    %61 = math.tanh %60 : vector<8x32xf32>
    %62 = arith.mulf %57, %61 : vector<8x32xf32>
    %63 = vector.broadcast %c1_i32 : i32 to vector<8x1xi32>
    %64 = arith.cmpi slt, %63, %10 : vector<8x1xi32>
    %65 = vector.shape_cast %64 : vector<8x1xi1> to vector<8x1xi1>
    %66 = vector.broadcast %65 : vector<8x1xi1> to vector<8x32xi1>
    %67 = arith.select %66, %62, %38 : vector<8x32xi1>, vector<8x32xf32>
    %68 = vector.shape_cast %64 : vector<8x1xi1> to vector<8x1xi1>
    %69 = vector.broadcast %68 : vector<8x1xi1> to vector<8x32xi1>
    %70 = arith.select %69, %60, %41 : vector<8x32xi1>, vector<8x32xf32>
    %c2_i32 = arith.constant 2 : i32
    %c8_i32_22 = arith.constant 8 : i32
    %71 = arith.muli %c2_i32, %c8_i32_22 : i32
    %72 = tpu.assume_multiple %71, 8 : i32
    %73 = arith.index_cast %72 : i32 to index
    %c0_23 = arith.constant 0 : index
    %74 = vector.load %arg7[%73, %c0_23] : memref<80x128xf32, #tpu.memory_space<vmem>>, vector<8x128xf32>
    %cst_24 = arith.constant dense<0.000000e+00> : vector<8x128xf32>
    %75 = tpu.matmul %67, %8, %cst_24 {dimension_numbers = #tpu.dot_dimension_numbers<[1], [0], [0], [1], [0, 0, 1, 1], [], []>} : vector<8x32xf32>, vector<32x128xf32>, vector<8x128xf32> -> vector<8x128xf32>
    %76 = arith.addf %74, %75 : vector<8x128xf32>
    %77 = arith.negf %76 : vector<8x128xf32>
    %78 = math.exp %77 : vector<8x128xf32>
    %cst_25 = arith.constant 1.000000e+00 : f32
    %79 = vector.broadcast %cst_25 : f32 to vector<8x128xf32>
    %80 = arith.addf %79, %78 : vector<8x128xf32>
    %81 = arith.divf %79, %80 : vector<8x128xf32>
    %82 = math.tanh %76 : vector<8x128xf32>
    %83 = vector.extract_strided_slice %81 {offsets = [0, 0], sizes = [8, 32], strides = [1, 1]} : vector<8x128xf32> to vector<8x32xf32>
    %84 = vector.extract_strided_slice %81 {offsets = [0, 32], sizes = [8, 32], strides = [1, 1]} : vector<8x128xf32> to vector<8x32xf32>
    %85 = vector.extract_strided_slice %82 {offsets = [0, 64], sizes = [8, 32], strides = [1, 1]} : vector<8x128xf32> to vector<8x32xf32>
    %86 = vector.extract_strided_slice %81 {offsets = [0, 96], sizes = [8, 32], strides = [1, 1]} : vector<8x128xf32> to vector<8x32xf32>
    %87 = arith.mulf %84, %70 : vector<8x32xf32>
    %88 = arith.mulf %83, %85 : vector<8x32xf32>
    %89 = arith.addf %87, %88 : vector<8x32xf32>
    %90 = math.tanh %89 : vector<8x32xf32>
    %91 = arith.mulf %86, %90 : vector<8x32xf32>
    %92 = vector.broadcast %c2_i32 : i32 to vector<8x1xi32>
    %93 = arith.cmpi slt, %92, %10 : vector<8x1xi32>
    %94 = vector.shape_cast %93 : vector<8x1xi1> to vector<8x1xi1>
    %95 = vector.broadcast %94 : vector<8x1xi1> to vector<8x32xi1>
    %96 = arith.select %95, %91, %67 : vector<8x32xi1>, vector<8x32xf32>
    %97 = vector.shape_cast %93 : vector<8x1xi1> to vector<8x1xi1>
    %98 = vector.broadcast %97 : vector<8x1xi1> to vector<8x32xi1>
    %99 = arith.select %98, %89, %70 : vector<8x32xi1>, vector<8x32xf32>
    %c3_i32 = arith.constant 3 : i32
    %c8_i32_26 = arith.constant 8 : i32
    %100 = arith.muli %c3_i32, %c8_i32_26 : i32
    %101 = tpu.assume_multiple %100, 8 : i32
    %102 = arith.index_cast %101 : i32 to index
    %c0_27 = arith.constant 0 : index
    %103 = vector.load %arg7[%102, %c0_27] : memref<80x128xf32, #tpu.memory_space<vmem>>, vector<8x128xf32>
    %cst_28 = arith.constant dense<0.000000e+00> : vector<8x128xf32>
    %104 = tpu.matmul %96, %8, %cst_28 {dimension_numbers = #tpu.dot_dimension_numbers<[1], [0], [0], [1], [0, 0, 1, 1], [], []>} : vector<8x32xf32>, vector<32x128xf32>, vector<8x128xf32> -> vector<8x128xf32>
    %105 = arith.addf %103, %104 : vector<8x128xf32>
    %106 = arith.negf %105 : vector<8x128xf32>
    %107 = math.exp %106 : vector<8x128xf32>
    %cst_29 = arith.constant 1.000000e+00 : f32
    %108 = vector.broadcast %cst_29 : f32 to vector<8x128xf32>
    %109 = arith.addf %108, %107 : vector<8x128xf32>
    %110 = arith.divf %108, %109 : vector<8x128xf32>
    %111 = math.tanh %105 : vector<8x128xf32>
    %112 = vector.extract_strided_slice %110 {offsets = [0, 0], sizes = [8, 32], strides = [1, 1]} : vector<8x128xf32> to vector<8x32xf32>
    %113 = vector.extract_strided_slice %110 {offsets = [0, 32], sizes = [8, 32], strides = [1, 1]} : vector<8x128xf32> to vector<8x32xf32>
    %114 = vector.extract_strided_slice %111 {offsets = [0, 64], sizes = [8, 32], strides = [1, 1]} : vector<8x128xf32> to vector<8x32xf32>
    %115 = vector.extract_strided_slice %110 {offsets = [0, 96], sizes = [8, 32], strides = [1, 1]} : vector<8x128xf32> to vector<8x32xf32>
    %116 = arith.mulf %113, %99 : vector<8x32xf32>
    %117 = arith.mulf %112, %114 : vector<8x32xf32>
    %118 = arith.addf %116, %117 : vector<8x32xf32>
    %119 = math.tanh %118 : vector<8x32xf32>
    %120 = arith.mulf %115, %119 : vector<8x32xf32>
    %121 = vector.broadcast %c3_i32 : i32 to vector<8x1xi32>
    %122 = arith.cmpi slt, %121, %10 : vector<8x1xi32>
    %123 = vector.shape_cast %122 : vector<8x1xi1> to vector<8x1xi1>
    %124 = vector.broadcast %123 : vector<8x1xi1> to vector<8x32xi1>
    %125 = arith.select %124, %120, %96 : vector<8x32xi1>, vector<8x32xf32>
    %126 = vector.shape_cast %122 : vector<8x1xi1> to vector<8x1xi1>
    %127 = vector.broadcast %126 : vector<8x1xi1> to vector<8x32xi1>
    %128 = arith.select %127, %118, %99 : vector<8x32xi1>, vector<8x32xf32>
    %c4_i32 = arith.constant 4 : i32
    %c8_i32_30 = arith.constant 8 : i32
    %129 = arith.muli %c4_i32, %c8_i32_30 : i32
    %130 = tpu.assume_multiple %129, 8 : i32
    %131 = arith.index_cast %130 : i32 to index
    %c0_31 = arith.constant 0 : index
    %132 = vector.load %arg7[%131, %c0_31] : memref<80x128xf32, #tpu.memory_space<vmem>>, vector<8x128xf32>
    %cst_32 = arith.constant dense<0.000000e+00> : vector<8x128xf32>
    %133 = tpu.matmul %125, %8, %cst_32 {dimension_numbers = #tpu.dot_dimension_numbers<[1], [0], [0], [1], [0, 0, 1, 1], [], []>} : vector<8x32xf32>, vector<32x128xf32>, vector<8x128xf32> -> vector<8x128xf32>
    %134 = arith.addf %132, %133 : vector<8x128xf32>
    %135 = arith.negf %134 : vector<8x128xf32>
    %136 = math.exp %135 : vector<8x128xf32>
    %cst_33 = arith.constant 1.000000e+00 : f32
    %137 = vector.broadcast %cst_33 : f32 to vector<8x128xf32>
    %138 = arith.addf %137, %136 : vector<8x128xf32>
    %139 = arith.divf %137, %138 : vector<8x128xf32>
    %140 = math.tanh %134 : vector<8x128xf32>
    %141 = vector.extract_strided_slice %139 {offsets = [0, 0], sizes = [8, 32], strides = [1, 1]} : vector<8x128xf32> to vector<8x32xf32>
    %142 = vector.extract_strided_slice %139 {offsets = [0, 32], sizes = [8, 32], strides = [1, 1]} : vector<8x128xf32> to vector<8x32xf32>
    %143 = vector.extract_strided_slice %140 {offsets = [0, 64], sizes = [8, 32], strides = [1, 1]} : vector<8x128xf32> to vector<8x32xf32>
    %144 = vector.extract_strided_slice %139 {offsets = [0, 96], sizes = [8, 32], strides = [1, 1]} : vector<8x128xf32> to vector<8x32xf32>
    %145 = arith.mulf %142, %128 : vector<8x32xf32>
    %146 = arith.mulf %141, %143 : vector<8x32xf32>
    %147 = arith.addf %145, %146 : vector<8x32xf32>
    %148 = math.tanh %147 : vector<8x32xf32>
    %149 = arith.mulf %144, %148 : vector<8x32xf32>
    %150 = vector.broadcast %c4_i32 : i32 to vector<8x1xi32>
    %151 = arith.cmpi slt, %150, %10 : vector<8x1xi32>
    %152 = vector.shape_cast %151 : vector<8x1xi1> to vector<8x1xi1>
    %153 = vector.broadcast %152 : vector<8x1xi1> to vector<8x32xi1>
    %154 = arith.select %153, %149, %125 : vector<8x32xi1>, vector<8x32xf32>
    %155 = vector.shape_cast %151 : vector<8x1xi1> to vector<8x1xi1>
    %156 = vector.broadcast %155 : vector<8x1xi1> to vector<8x32xi1>
    %157 = arith.select %156, %147, %128 : vector<8x32xi1>, vector<8x32xf32>
    %c5_i32 = arith.constant 5 : i32
    %c8_i32_34 = arith.constant 8 : i32
    %158 = arith.muli %c5_i32, %c8_i32_34 : i32
    %159 = tpu.assume_multiple %158, 8 : i32
    %160 = arith.index_cast %159 : i32 to index
    %c0_35 = arith.constant 0 : index
    %161 = vector.load %arg7[%160, %c0_35] : memref<80x128xf32, #tpu.memory_space<vmem>>, vector<8x128xf32>
    %cst_36 = arith.constant dense<0.000000e+00> : vector<8x128xf32>
    %162 = tpu.matmul %154, %8, %cst_36 {dimension_numbers = #tpu.dot_dimension_numbers<[1], [0], [0], [1], [0, 0, 1, 1], [], []>} : vector<8x32xf32>, vector<32x128xf32>, vector<8x128xf32> -> vector<8x128xf32>
    %163 = arith.addf %161, %162 : vector<8x128xf32>
    %164 = arith.negf %163 : vector<8x128xf32>
    %165 = math.exp %164 : vector<8x128xf32>
    %cst_37 = arith.constant 1.000000e+00 : f32
    %166 = vector.broadcast %cst_37 : f32 to vector<8x128xf32>
    %167 = arith.addf %166, %165 : vector<8x128xf32>
    %168 = arith.divf %166, %167 : vector<8x128xf32>
    %169 = math.tanh %163 : vector<8x128xf32>
    %170 = vector.extract_strided_slice %168 {offsets = [0, 0], sizes = [8, 32], strides = [1, 1]} : vector<8x128xf32> to vector<8x32xf32>
    %171 = vector.extract_strided_slice %168 {offsets = [0, 32], sizes = [8, 32], strides = [1, 1]} : vector<8x128xf32> to vector<8x32xf32>
    %172 = vector.extract_strided_slice %169 {offsets = [0, 64], sizes = [8, 32], strides = [1, 1]} : vector<8x128xf32> to vector<8x32xf32>
    %173 = vector.extract_strided_slice %168 {offsets = [0, 96], sizes = [8, 32], strides = [1, 1]} : vector<8x128xf32> to vector<8x32xf32>
    %174 = arith.mulf %171, %157 : vector<8x32xf32>
    %175 = arith.mulf %170, %172 : vector<8x32xf32>
    %176 = arith.addf %174, %175 : vector<8x32xf32>
    %177 = math.tanh %176 : vector<8x32xf32>
    %178 = arith.mulf %173, %177 : vector<8x32xf32>
    %179 = vector.broadcast %c5_i32 : i32 to vector<8x1xi32>
    %180 = arith.cmpi slt, %179, %10 : vector<8x1xi32>
    %181 = vector.shape_cast %180 : vector<8x1xi1> to vector<8x1xi1>
    %182 = vector.broadcast %181 : vector<8x1xi1> to vector<8x32xi1>
    %183 = arith.select %182, %178, %154 : vector<8x32xi1>, vector<8x32xf32>
    %184 = vector.shape_cast %180 : vector<8x1xi1> to vector<8x1xi1>
    %185 = vector.broadcast %184 : vector<8x1xi1> to vector<8x32xi1>
    %186 = arith.select %185, %176, %157 : vector<8x32xi1>, vector<8x32xf32>
    %c6_i32 = arith.constant 6 : i32
    %c8_i32_38 = arith.constant 8 : i32
    %187 = arith.muli %c6_i32, %c8_i32_38 : i32
    %188 = tpu.assume_multiple %187, 8 : i32
    %189 = arith.index_cast %188 : i32 to index
    %c0_39 = arith.constant 0 : index
    %190 = vector.load %arg7[%189, %c0_39] : memref<80x128xf32, #tpu.memory_space<vmem>>, vector<8x128xf32>
    %cst_40 = arith.constant dense<0.000000e+00> : vector<8x128xf32>
    %191 = tpu.matmul %183, %8, %cst_40 {dimension_numbers = #tpu.dot_dimension_numbers<[1], [0], [0], [1], [0, 0, 1, 1], [], []>} : vector<8x32xf32>, vector<32x128xf32>, vector<8x128xf32> -> vector<8x128xf32>
    %192 = arith.addf %190, %191 : vector<8x128xf32>
    %193 = arith.negf %192 : vector<8x128xf32>
    %194 = math.exp %193 : vector<8x128xf32>
    %cst_41 = arith.constant 1.000000e+00 : f32
    %195 = vector.broadcast %cst_41 : f32 to vector<8x128xf32>
    %196 = arith.addf %195, %194 : vector<8x128xf32>
    %197 = arith.divf %195, %196 : vector<8x128xf32>
    %198 = math.tanh %192 : vector<8x128xf32>
    %199 = vector.extract_strided_slice %197 {offsets = [0, 0], sizes = [8, 32], strides = [1, 1]} : vector<8x128xf32> to vector<8x32xf32>
    %200 = vector.extract_strided_slice %197 {offsets = [0, 32], sizes = [8, 32], strides = [1, 1]} : vector<8x128xf32> to vector<8x32xf32>
    %201 = vector.extract_strided_slice %198 {offsets = [0, 64], sizes = [8, 32], strides = [1, 1]} : vector<8x128xf32> to vector<8x32xf32>
    %202 = vector.extract_strided_slice %197 {offsets = [0, 96], sizes = [8, 32], strides = [1, 1]} : vector<8x128xf32> to vector<8x32xf32>
    %203 = arith.mulf %200, %186 : vector<8x32xf32>
    %204 = arith.mulf %199, %201 : vector<8x32xf32>
    %205 = arith.addf %203, %204 : vector<8x32xf32>
    %206 = math.tanh %205 : vector<8x32xf32>
    %207 = arith.mulf %202, %206 : vector<8x32xf32>
    %208 = vector.broadcast %c6_i32 : i32 to vector<8x1xi32>
    %209 = arith.cmpi slt, %208, %10 : vector<8x1xi32>
    %210 = vector.shape_cast %209 : vector<8x1xi1> to vector<8x1xi1>
    %211 = vector.broadcast %210 : vector<8x1xi1> to vector<8x32xi1>
    %212 = arith.select %211, %207, %183 : vector<8x32xi1>, vector<8x32xf32>
    %213 = vector.shape_cast %209 : vector<8x1xi1> to vector<8x1xi1>
    %214 = vector.broadcast %213 : vector<8x1xi1> to vector<8x32xi1>
    %215 = arith.select %214, %205, %186 : vector<8x32xi1>, vector<8x32xf32>
    %c7_i32 = arith.constant 7 : i32
    %c8_i32_42 = arith.constant 8 : i32
    %216 = arith.muli %c7_i32, %c8_i32_42 : i32
    %217 = tpu.assume_multiple %216, 8 : i32
    %218 = arith.index_cast %217 : i32 to index
    %c0_43 = arith.constant 0 : index
    %219 = vector.load %arg7[%218, %c0_43] : memref<80x128xf32, #tpu.memory_space<vmem>>, vector<8x128xf32>
    %cst_44 = arith.constant dense<0.000000e+00> : vector<8x128xf32>
    %220 = tpu.matmul %212, %8, %cst_44 {dimension_numbers = #tpu.dot_dimension_numbers<[1], [0], [0], [1], [0, 0, 1, 1], [], []>} : vector<8x32xf32>, vector<32x128xf32>, vector<8x128xf32> -> vector<8x128xf32>
    %221 = arith.addf %219, %220 : vector<8x128xf32>
    %222 = arith.negf %221 : vector<8x128xf32>
    %223 = math.exp %222 : vector<8x128xf32>
    %cst_45 = arith.constant 1.000000e+00 : f32
    %224 = vector.broadcast %cst_45 : f32 to vector<8x128xf32>
    %225 = arith.addf %224, %223 : vector<8x128xf32>
    %226 = arith.divf %224, %225 : vector<8x128xf32>
    %227 = math.tanh %221 : vector<8x128xf32>
    %228 = vector.extract_strided_slice %226 {offsets = [0, 0], sizes = [8, 32], strides = [1, 1]} : vector<8x128xf32> to vector<8x32xf32>
    %229 = vector.extract_strided_slice %226 {offsets = [0, 32], sizes = [8, 32], strides = [1, 1]} : vector<8x128xf32> to vector<8x32xf32>
    %230 = vector.extract_strided_slice %227 {offsets = [0, 64], sizes = [8, 32], strides = [1, 1]} : vector<8x128xf32> to vector<8x32xf32>
    %231 = vector.extract_strided_slice %226 {offsets = [0, 96], sizes = [8, 32], strides = [1, 1]} : vector<8x128xf32> to vector<8x32xf32>
    %232 = arith.mulf %229, %215 : vector<8x32xf32>
    %233 = arith.mulf %228, %230 : vector<8x32xf32>
    %234 = arith.addf %232, %233 : vector<8x32xf32>
    %235 = math.tanh %234 : vector<8x32xf32>
    %236 = arith.mulf %231, %235 : vector<8x32xf32>
    %237 = vector.broadcast %c7_i32 : i32 to vector<8x1xi32>
    %238 = arith.cmpi slt, %237, %10 : vector<8x1xi32>
    %239 = vector.shape_cast %238 : vector<8x1xi1> to vector<8x1xi1>
    %240 = vector.broadcast %239 : vector<8x1xi1> to vector<8x32xi1>
    %241 = arith.select %240, %236, %212 : vector<8x32xi1>, vector<8x32xf32>
    %242 = vector.shape_cast %238 : vector<8x1xi1> to vector<8x1xi1>
    %243 = vector.broadcast %242 : vector<8x1xi1> to vector<8x32xi1>
    %244 = arith.select %243, %234, %215 : vector<8x32xi1>, vector<8x32xf32>
    %c8_i32_46 = arith.constant 8 : i32
    %c8_i32_47 = arith.constant 8 : i32
    %245 = arith.muli %c8_i32_46, %c8_i32_47 : i32
    %246 = tpu.assume_multiple %245, 8 : i32
    %247 = arith.index_cast %246 : i32 to index
    %c0_48 = arith.constant 0 : index
    %248 = vector.load %arg7[%247, %c0_48] : memref<80x128xf32, #tpu.memory_space<vmem>>, vector<8x128xf32>
    %cst_49 = arith.constant dense<0.000000e+00> : vector<8x128xf32>
    %249 = tpu.matmul %241, %8, %cst_49 {dimension_numbers = #tpu.dot_dimension_numbers<[1], [0], [0], [1], [0, 0, 1, 1], [], []>} : vector<8x32xf32>, vector<32x128xf32>, vector<8x128xf32> -> vector<8x128xf32>
    %250 = arith.addf %248, %249 : vector<8x128xf32>
    %251 = arith.negf %250 : vector<8x128xf32>
    %252 = math.exp %251 : vector<8x128xf32>
    %cst_50 = arith.constant 1.000000e+00 : f32
    %253 = vector.broadcast %cst_50 : f32 to vector<8x128xf32>
    %254 = arith.addf %253, %252 : vector<8x128xf32>
    %255 = arith.divf %253, %254 : vector<8x128xf32>
    %256 = math.tanh %250 : vector<8x128xf32>
    %257 = vector.extract_strided_slice %255 {offsets = [0, 0], sizes = [8, 32], strides = [1, 1]} : vector<8x128xf32> to vector<8x32xf32>
    %258 = vector.extract_strided_slice %255 {offsets = [0, 32], sizes = [8, 32], strides = [1, 1]} : vector<8x128xf32> to vector<8x32xf32>
    %259 = vector.extract_strided_slice %256 {offsets = [0, 64], sizes = [8, 32], strides = [1, 1]} : vector<8x128xf32> to vector<8x32xf32>
    %260 = vector.extract_strided_slice %255 {offsets = [0, 96], sizes = [8, 32], strides = [1, 1]} : vector<8x128xf32> to vector<8x32xf32>
    %261 = arith.mulf %258, %244 : vector<8x32xf32>
    %262 = arith.mulf %257, %259 : vector<8x32xf32>
    %263 = arith.addf %261, %262 : vector<8x32xf32>
    %264 = math.tanh %263 : vector<8x32xf32>
    %265 = arith.mulf %260, %264 : vector<8x32xf32>
    %266 = vector.broadcast %c8_i32_46 : i32 to vector<8x1xi32>
    %267 = arith.cmpi slt, %266, %10 : vector<8x1xi32>
    %268 = vector.shape_cast %267 : vector<8x1xi1> to vector<8x1xi1>
    %269 = vector.broadcast %268 : vector<8x1xi1> to vector<8x32xi1>
    %270 = arith.select %269, %265, %241 : vector<8x32xi1>, vector<8x32xf32>
    %271 = vector.shape_cast %267 : vector<8x1xi1> to vector<8x1xi1>
    %272 = vector.broadcast %271 : vector<8x1xi1> to vector<8x32xi1>
    %273 = arith.select %272, %263, %244 : vector<8x32xi1>, vector<8x32xf32>
    %c9_i32 = arith.constant 9 : i32
    %c8_i32_51 = arith.constant 8 : i32
    %274 = arith.muli %c9_i32, %c8_i32_51 : i32
    %275 = tpu.assume_multiple %274, 8 : i32
    %276 = arith.index_cast %275 : i32 to index
    %c0_52 = arith.constant 0 : index
    %277 = vector.load %arg7[%276, %c0_52] : memref<80x128xf32, #tpu.memory_space<vmem>>, vector<8x128xf32>
    %cst_53 = arith.constant dense<0.000000e+00> : vector<8x128xf32>
    %278 = tpu.matmul %270, %8, %cst_53 {dimension_numbers = #tpu.dot_dimension_numbers<[1], [0], [0], [1], [0, 0, 1, 1], [], []>} : vector<8x32xf32>, vector<32x128xf32>, vector<8x128xf32> -> vector<8x128xf32>
    %279 = arith.addf %277, %278 : vector<8x128xf32>
    %280 = arith.negf %279 : vector<8x128xf32>
    %281 = math.exp %280 : vector<8x128xf32>
    %cst_54 = arith.constant 1.000000e+00 : f32
    %282 = vector.broadcast %cst_54 : f32 to vector<8x128xf32>
    %283 = arith.addf %282, %281 : vector<8x128xf32>
    %284 = arith.divf %282, %283 : vector<8x128xf32>
    %285 = math.tanh %279 : vector<8x128xf32>
    %286 = vector.extract_strided_slice %284 {offsets = [0, 0], sizes = [8, 32], strides = [1, 1]} : vector<8x128xf32> to vector<8x32xf32>
    %287 = vector.extract_strided_slice %284 {offsets = [0, 32], sizes = [8, 32], strides = [1, 1]} : vector<8x128xf32> to vector<8x32xf32>
    %288 = vector.extract_strided_slice %285 {offsets = [0, 64], sizes = [8, 32], strides = [1, 1]} : vector<8x128xf32> to vector<8x32xf32>
    %289 = vector.extract_strided_slice %284 {offsets = [0, 96], sizes = [8, 32], strides = [1, 1]} : vector<8x128xf32> to vector<8x32xf32>
    %290 = arith.mulf %287, %273 : vector<8x32xf32>
    %291 = arith.mulf %286, %288 : vector<8x32xf32>
    %292 = arith.addf %290, %291 : vector<8x32xf32>
    %293 = math.tanh %292 : vector<8x32xf32>
    %294 = arith.mulf %289, %293 : vector<8x32xf32>
    %295 = vector.broadcast %c9_i32 : i32 to vector<8x1xi32>
    %296 = arith.cmpi slt, %295, %10 : vector<8x1xi32>
    %297 = vector.shape_cast %296 : vector<8x1xi1> to vector<8x1xi1>
    %298 = vector.broadcast %297 : vector<8x1xi1> to vector<8x32xi1>
    %299 = arith.select %298, %294, %270 : vector<8x32xi1>, vector<8x32xf32>
    %300 = vector.shape_cast %296 : vector<8x1xi1> to vector<8x1xi1>
    %301 = vector.broadcast %300 : vector<8x1xi1> to vector<8x32xi1>
    %302 = arith.select %301, %292, %273 : vector<8x32xi1>, vector<8x32xf32>
    %c10_i32 = arith.constant 10 : i32
    %c0_55 = arith.constant 0 : index
    %c0_56 = arith.constant 0 : index
    %c0_57 = arith.constant 0 : index
    %303 = vector.load %arg6[%c0_55, %c0_56, %c0_57] : memref<1x8x32xf32, #tpu.memory_space<vmem>>, vector<1x8x32xf32>
    %304 = vector.shape_cast %303 : vector<1x8x32xf32> to vector<8x32xf32>
    %305 = vector.shape_cast %299 : vector<8x32xf32> to vector<1x8x32xf32>
    tpu.vector_store %arg6[%c0_55, %c0_56, %c0_57], %305 {strides = array<i32>} : memref<1x8x32xf32, #tpu.memory_space<vmem>>, vector<1x8x32xf32>,
    return
  }
  func.func @transform_0(%arg0: i32) -> (i32, i32, i32) {
    %c0_i32 = arith.constant 0 : i32
    %c0_i32_0 = arith.constant 0 : i32
    %c0_i32_1 = arith.constant 0 : i32
    return %arg0, %c0_i32, %c0_i32_0 : i32, i32, i32
  }
  func.func @transform_1(%arg0: i32) -> (i32, i32, i32) {
    %c0_i32 = arith.constant 0 : i32
    %c0_i32_0 = arith.constant 0 : i32
    %c0_i32_1 = arith.constant 0 : i32
    return %arg0, %c0_i32, %c0_i32_0 : i32, i32, i32
  }
  func.func @transform_2(%arg0: i32) -> (i32, i32) {
    %c0_i32 = arith.constant 0 : i32
    %c0_i32_0 = arith.constant 0 : i32
    %c0_i32_1 = arith.constant 0 : i32
    return %c0_i32, %c0_i32_0 : i32, i32
  }
  func.func @transform_3(%arg0: i32) -> (i32, i32) {
    %c0_i32 = arith.constant 0 : i32
    %c0_i32_0 = arith.constant 0 : i32
    %c0_i32_1 = arith.constant 0 : i32
    return %c0_i32, %c0_i32_0 : i32, i32
  }
  func.func @transform_4(%arg0: i32) -> (i32, i32) {
    %c0_i32 = arith.constant 0 : i32
    %c0_i32_0 = arith.constant 0 : i32
    %c0_i32_1 = arith.constant 0 : i32
    return %c0_i32, %c0_i32_0 : i32, i32
  }
  func.func @transform_5(%arg0: i32) -> (i32, i32, i32) {
    %c0_i32 = arith.constant 0 : i32
    %c0_i32_0 = arith.constant 0 : i32
    %c0_i32_1 = arith.constant 0 : i32
    return %arg0, %c0_i32, %c0_i32_0 : i32, i32, i32
  }
}

</mosaic_0001>

<bundles_post_ra>
// kernel: text_lstm_encoder_forward.1
= control target key start
LH: loop header
LB: loop body
LE: loop exit
PB: predicated region body
PF: predicated region fallthrough
CT: control target
= control target key end

     0   :  { %s2023_s18 = smov 0   ;;  %s2285_s0 = inlined_call_operand.vmem [shape: s32[2,8,1], index: 0, kind: input, shape index: {}]   ;;  %s2286_s1 = inlined_call_operand.vmem [shape: f32[2,80,16], index: 1, kind: input, shape index: {}]   ;;  %s2287_s2 = inlined_call_operand.vmem [shape: f32[16,128], index: 2, kind: input, shape index: {}]   ;;  %s2288_s3 = inlined_call_operand.vmem [shape: f32[32,128], index: 3, kind: input, shape index: {}]   ;;  %s2289_s4 = inlined_call_operand.vmem [shape: f32[1,128], index: 4, kind: input, shape index: {}]   ;;  %s2290_s5 = inlined_call_operand.vmem [shape: f32[2,8,32], index: 5, kind: output, shape index: {}]  }
   0x1 LB: > { %s1587_s19 = sadd.s32 4294967295, %s1985_s18   ;;  %p1591_p0 = scmp.ge.s32.totalorder %s1985_s18, 1  ;;  %s1985_s18 = sphi %s2023_s18, %s15_s18  }
   0x2   : > { %p196_p1 = scmp.lt.s32.totalorder %s1985_s18, 3 }
   0x4   : > { %p197_p2 = pnand %p1591_p0, %p196_p1 }
   0x5   : > { %v415_v0 = vld [vmem:[%s2288_s3] sm:$0xff] (!%p197_p2)  ;;  %v416_v1 = vld [vmem:[%s2288_s3 + $0x8] sm:$0xff] (!%p197_p2)  ;;  %p227_p3 = scmp.lt.s32.totalorder (!%p197_p2), %s1587_s19, 1  ;;  %v1987_v3 = vmov (!%p197_p2), 0.0|0.0   ;;  %v417_v6 = vld [vmem:[%s2288_s3 + $0x10] sm:$0xff] (!%p197_p2)  ;;  %vm1988_vm0 = vmmov (!%p197_p2), 0  }
   0x6   : > { %200 = sbr.rel (%p197_p2) target bundleno = 7053 (0x1b8d), region = 40  ;;  %v250_v2 = vld [vmem:[%s2287_s2] sm:$0xff] (!%p197_p2)  ;;  %1822 = vmatprep.subr.bf16.mxu1 (!%p197_p2), %v1987_v3  ;;  %v2041_v4 = vpack.c.bf16 (!%p197_p2), %v416_v1, %v415_v0  ;;  %v251_v5 = vld [vmem:[%s2287_s2 + $0x8] sm:$0xff] (!%p197_p2)  ;;  %v418_v7 = vld [vmem:[%s2288_s3 + $0x18] sm:$0xff] (!%p197_p2)  ;;  %v1989_v9 = vmov (!%p197_p2), 0.0   ;;  %vm259_vm1 = vcmask (!%p197_p2), 130048  }
   0x7   : > { %v1818_v8 = vpack.c.bf16 (!%p197_p2), %v251_v5, %v250_v2  ;;  %1716 = vmatprep.mubr.msk.f32.mxu1 (!%p197_p2), %vm1988_vm0, %v1989_v9  ;;  %v2057_v10 = vpack.c.bf16 (!%p197_p2), %v418_v7, %v417_v6  ;;  %v1990_v13 = vmov (!%p197_p2), 0   ;;  %v2099_v16 = vld [vmem:[%s2289_s4] ss:$0 sm:$0xff] (!%p197_p2)  ;;  %s1991_s17 = smov (!%p197_p2), 64   ;;  %s1992_s20 = smov (!%p197_p2), 32   ;;  %vm421_vm4 = vcmask (!%p197_p2), 261120  }
   0x8   : > { %1824 = vmatpush3.bf16.msra.mxu1 (!%p197_p2), %v2041_v4  ;;  %1897 = vset.pattern.permute.xlu1 (!%p197_p2), %v1990_v13 }
   0x9   : > { %1819 = vmatprep.subr.bf16.mxu0 (!%p197_p2), %v1818_v8  ;;  %1825 = vmatprep.subr.bf16.mxu1 (!%p197_p2), %v1987_v3 }
   0xa   : > { %1821 = vmatpush3.bf16.msra.mxu0 (!%p197_p2), %v1818_v8  ;;  %1898 = vset.pattern.permute.xlu0 (!%p197_p2), %v1990_v13 }
   0xb   : > { %1834 = vmatprep.subr.bf16.mxu0 (!%p197_p2), %v1987_v3 }
   0xc   : > { %1827 = vmatpush3.bf16.msra.mxu1 (!%p197_p2), %v2057_v10 }
   0xd   : > { %s2292_s19 = smov (!%p227_p3, %s1587_s19), 1  ;;  %1828 = vmatprep.subr.bf16.mxu1 %v1987_v3 }
   0xe   : > { %s1882_s7 = smul.u32 80, %s2292_s19  ;;  %s1592_s11 = sshll.u32 %s2292_s19, 3 }
   0xf   : > { %1717 = vmatmul.mubr.f32.vlgmr.msra.gmra.mrb[0].mxu1 %v1989_v9  ;;  %s230_s14 = scalar_lea.vmem %s2285_s0, %s1592_s11  ;;  %s239_s23 = scalar_lea.vmem %s2290_s5, %s1592_s11 }
  0x10   : > { %s2064_s10 = scalar_lea.vmem %s2286_s1, %s1882_s7  ;;  %1830 = vmatpush3.bf16.msra.mxu1 %v2041_v4  ;;  %1727 = vmatprep.mubr.msk.f32.mxu1 %vm1988_vm0, %v1989_v9  ;;  %v2092_v14 = vld [vmem:[%s230_s14] sm:$0xff] }
  0x11   : > { %v240_v11 = vld [vmem:[%s2064_s10] sm:$0xff]  ;;  %v241_v12 = vld [vmem:[%s2064_s10 + $0x8] sm:$0xff]  ;;  %1831 = vmatprep.subr.bf16.mxu1 %v1987_v3  ;;  %vm520_vm2 = vcmp.gt.s32.totalorder %v2092_v14, 0  ;;  %vm630_vm5 = vcmp.gt.s32.totalorder %v2092_v14, 1  ;;  %v242_v55 = vld [vmem:[%s2064_s10 + $0x10] sm:$0xff]  ;;  %vm740_vm7 = vcmp.gt.s32.totalorder %v2092_v14, 2 }
  0x12   : > { %1693 = vmatprep.mubr.msk.f32.mxu0 %vm259_vm1, %v240_v11  ;;  %v521_v15 = vsel %vm520_vm2, 1, %v1990_v13  ;;  %v631_v44 = vsel %vm630_vm5, 1, %v1990_v13  ;;  %v243_v56 = vld [vmem:[%s2064_s10 + $0x18] sm:$0xff]  ;;  %v244_v57 = vld [vmem:[%s2064_s10 + $0x20] sm:$0xff]  ;;  %v245_v58 = vld [vmem:[%s2064_s10 + $0x28] sm:$0xff]  ;;  %vm850_vm9 = vcmp.gt.s32.totalorder %v2092_v14, 3 }
  0x13   : > { %1694 = vmatmul.mubr.msk.f32.vlgmr.msra.gmra.mrb[0].mxu0 %vm259_vm1, %v241_v12  ;;  %523 = vperm.xlu1 %1897, %v521_v15   ;;  %v246_v59 = vld [vmem:[%s2064_s10 + $0x30] sm:$0xff]  ;;  %v247_v60 = vld [vmem:[%s2064_s10 + $0x38] sm:$0xff]  ;;  %v248_v61 = vld [vmem:[%s2064_s10 + $0x40] sm:$0xff]  ;;  %vm960_vm11 = vcmp.gt.s32.totalorder %v2092_v14, 4  ;;  %vm1070_vm13 = vcmp.gt.s32.totalorder %v2092_v14, 5  ;;  %vm1180_vm15 = vcmp.gt.s32.totalorder %v2092_v14, 6 }
  0x14   : > { %1836 = vmatpush3.bf16.msra.mxu0 %v2041_v4  ;;  %1833 = vmatpush3.bf16.msra.mxu1 %v2057_v10  ;;  %v249_v63 = vld [vmem:[%s2064_s10 + $0x48] sm:$0xff]  ;;  %vm1290_vm2 = vcmp.gt.s32.totalorder %v2092_v14, 7 }
  0x15   : > { %1837 = vmatprep.subr.bf16.mxu0 %v1987_v3  ;;  %1840 = vmatprep.subr.bf16.mxu1 %v1987_v3 }
  0x16   : > { %1696 = vmatprep.mubr.msk.f32.mxu0 %vm259_vm1, %v242_v55 }
  0x17   : > { %1697 = vmatmul.mubr.msk.f32.gmra.mrb[2].mxu0 %vm259_vm1, %v243_v56 }
  0x18   : > { %1839 = vmatpush3.bf16.msra.mxu0 %v2057_v10  ;;  %1699 = vmatprep.mubr.msk.f32.mxu0 %vm259_vm1, %v244_v57 }
  0x19   : > { %1846 = vmatprep.subr.bf16.mxu0 %v1987_v3 }
  0x1b   : > { %1700 = vmatmul.mubr.msk.f32.gmra.mrb[4].mxu0 %vm259_vm1, %v245_v58 }
  0x1c   : > { %1702 = vmatprep.mubr.msk.f32.mxu0 %vm259_vm1, %v246_v59 }
  0x1f   : > { %1703 = vmatmul.mubr.msk.f32.gmra.mrb[6].mxu0 %vm259_vm1, %v247_v60 }
  0x20   : > { %1705 = vmatprep.mubr.msk.f32.mxu0 %vm259_vm1, %v248_v61 }
  0x23   : > { %1706 = vmatmul.mubr.msk.f32.gmra.mrb[8].mxu0 %vm259_vm1, %v249_v63 }
  0x24   : > { %1738 = vmatprep.mubr.msk.f32.mxu0 %vm1988_vm0, %v1989_v9 }
  0x92   : > { %v524_v34 = vpop.permute.xlu1 %523 }
  0x93   : > { %vm525_vm3 = vcmp.eq.s32.totalorder %v524_v34, 1 }
  0xe2   : > { %v491_v19 = vpop.f32.mrb[0].mxu1 }
  0xe3   : > { %v1718_v21 = vpop.f32.mrb[1].mxu1 }
  0xe6   : > { %v1695_v17 = vpop.f32.mrb[0].mxu0 }
  0xe7   : > { %v356_v18 = vpop.f32.mrb[1].mxu0  ;;  %v362_v39 = vadd.f32 %v1695_v17, %v2099_v16 }
  0xe8   : > { %v357_v20 = vadd.f32 %v2099_v16, %v356_v18 }
  0xea   : > { %v495_v22 = vadd.f32 %v491_v19, %v357_v20  ;;  %v1698_v6 = vpop.f32.mrb[2].mxu0 }
  0xeb   : > { %v366_v7 = vpop.f32.mrb[3].mxu0 }
  0xec   : > { %1899 = vtanh.f32 %v495_v22  ;;  %v1606_v24 = vmul.f32 -1.442695, %v495_v22  ;;  %v367_v20 = vadd.f32 %v2099_v16, %v366_v7  ;;  %v961_v7 = vsel %vm960_vm11, 1, %v1990_v13 }
  0xee   : > { %1901 = vpow2.f32 %v1606_v24  ;;  %v2144_v8 = vpop.f32.mrb[4].mxu0 }
  0xef   : > { %v2146_v11 = vpop.f32.mrb[5].mxu0 }
  0xf2   : > { %v2148_v12 = vpop.f32.mrb[6].mxu0 }
  0xf3   : > { %v2150_v15 = vpop.f32.mrb[7].mxu0 }
  0xf6   : > { %v1900_v23 = vpop.eup %1899  ;;  %v2152_v17 = vpop.f32.mrb[8].mxu0 }
  0xf7   : > { %505 = vrot.lane.b32.xlu0 %v1900_v23, %s1991_s17  ;;  %v2154_v18 = vpop.f32.mrb[9].mxu0 }
  0xf8   : > { %v1902_v25 = vpop.eup %1901 }
  0xf9   : > { %v499_v26 = vadd.f32 1.0, %v1902_v25  ;;  %v741_v25 = vsel %vm740_vm7, 1, %v1990_v13 }
  0xfb   : > { %1903 = vrcp.f32 %v499_v26 }
 0x105   : > { %v1904_v27 = vpop.eup %1903 }
 0x106   : > { %v503_v30 = vmul.f32 0.0, %v1904_v27 }
 0x169   : > { %v506_v28 = vpop.permute.xlu0 %505 }
 0x16a   : > { %v508_v29 = vmul.f32 %v1904_v27, %v506_v28 }
 0x16c   : > { %510 = vrot.lane.b32.xlu0 %v508_v29, %s1992_s20 }
 0x1de   : > { %v511_v31 = vpop.permute.xlu0 %510 }
 0x1df   : > { %v513_v32 = vadd.f32 %v511_v31, %v503_v30 }
 0x1e1   : > { %1905 = vtanh.f32 %v513_v32  ;;  %v2120_v51 = vsel %vm525_vm3, %v513_v32, 0.0 }
 0x1eb   : > { %v1906_v33 = vpop.eup %1905 }
 0x1ec   : > { %516 = vrot.lane.b32.xlu1 %v1906_v33, %s1991_s17 }
 0x25e   : > { %v517_v35 = vpop.permute.xlu1 %516 }
 0x25f   : > { %v519_v36 = vmul.f32 %v1904_v27, %v517_v35 }
 0x261   : > { %v526_v37 = vsel %vm525_vm3, %v519_v36, 0.0  ;;  %vm1400_vm3 = vcmp.gt.s32.totalorder %v2092_v14, 8 }
 0x262   : > { %531 = vrot.lane.b32.xlu0 %v526_v37, %s1992_s20 }
 0x2d4   : > { %v532_v38 = vpop.permute.xlu0 %531 }
 0x2d5   : > { %1728 = vmatmul.mubr.msk.f32.vlgmr.msra.gmra.mrb[2].mxu1 %vm421_vm4, %v532_v38 }
 0x2d6   : > { %1842 = vmatpush3.bf16.msra.mxu1 %v2041_v4  ;;  %1749 = vmatprep.mubr.msk.f32.mxu1 %vm1988_vm0, %v1989_v9 }
 0x2d7   : > { %1843 = vmatprep.subr.bf16.mxu1 %v1987_v3 }
 0x2da   : > { %1845 = vmatpush3.bf16.msra.mxu1 %v2057_v10 }
 0x2db   : > { %1852 = vmatprep.subr.bf16.mxu1 %v1987_v3 }
 0x3a8   : > { %v601_v40 = vpop.f32.mrb[2].mxu1 }
 0x3a9   : > { %v605_v41 = vadd.f32 %v601_v40, %v362_v39  ;;  %v1729_v42 = vpop.f32.mrb[3].mxu1 }
 0x3aa   : > { %v372_v42 = vadd.f32 %v1698_v6, %v2099_v16 }
 0x3ab   : > { %1907 = vtanh.f32 %v605_v41  ;;  %v1608_v45 = vmul.f32 -1.442695, %v605_v41 }
 0x3ad   : > { %1909 = vpow2.f32 %v1608_v45 }
 0x3b5   : > { %v1908_v43 = vpop.eup %1907 }
 0x3b6   : > { %615 = vrot.lane.b32.xlu1 %v1908_v43, %s1991_s17 }
 0x3b7   : > { %v1910_v46 = vpop.eup %1909 }
 0x3b8   : > { %v609_v47 = vadd.f32 1.0, %v1910_v46 }
 0x3ba   : > { %633 = vperm.xlu1 %1897, %v631_v44   ;;  %1911 = vrcp.f32 %v609_v47  ;;  %v851_v47 = vsel %vm850_vm9, 1, %v1990_v13 }
 0x3c4   : > { %v1912_v48 = vpop.eup %1911 }
 0x3c5   : > { %v613_v52 = vmul.f32 %v1912_v48, %v2120_v51 }
 0x428   : > { %v616_v49 = vpop.permute.xlu1 %615 }
 0x429   : > { %v618_v50 = vmul.f32 %v1912_v48, %v616_v49 }
 0x42b   : > { %620 = vrot.lane.b32.xlu0 %v618_v50, %s1992_s20 }
 0x439   : > { %v634_v0 = vpop.permute.xlu1 %633 }
 0x43a   : > { %vm635_vm6 = vcmp.eq.s32.totalorder %v634_v0, 1  ;;  %v377_v0 = vadd.f32 %v2099_v16, %v2146_v11 }
 0x49d   : > { %v621_v53 = vpop.permute.xlu0 %620 }
 0x49e   : > { %v623_v54 = vadd.f32 %v621_v53, %v613_v52 }
 0x4a0   : > { %1913 = vtanh.f32 %v623_v54  ;;  %v637_v32 = vsel %vm635_vm6, %v623_v54, %v2120_v51 }
 0x4aa   : > { %v1914_v62 = vpop.eup %1913 }
 0x4ab   : > { %626 = vrot.lane.b32.xlu0 %v1914_v62, %s1991_s17 }
 0x51d   : > { %v627_v1 = vpop.permute.xlu0 %626 }
 0x51e   : > { %v629_v2 = vmul.f32 %v1912_v48, %v627_v1 }
 0x520   : > { %v636_v5 = vsel %vm635_vm6, %v629_v2, %v526_v37  ;;  %vm1510_vm6 = vcmp.gt.s32.totalorder %v2092_v14, 9 }
 0x521   : > { %641 = vrot.lane.b32.xlu1 %v636_v5, %s1992_s20 }
 0x593   : > { %v642_v19 = vpop.permute.xlu1 %641 }
 0x594   : > { %1739 = vmatmul.mubr.msk.f32.vlgmr.msra.gmra.mrb[10].mxu0 %vm421_vm4, %v642_v19 }
 0x595   : > { %1848 = vmatpush3.bf16.msra.mxu0 %v2041_v4  ;;  %1760 = vmatprep.mubr.msk.f32.mxu0 %vm1988_vm0, %v1989_v9 }
 0x596   : > { %1849 = vmatprep.subr.bf16.mxu0 %v1987_v3 }
 0x599   : > { %1851 = vmatpush3.bf16.msra.mxu0 %v2057_v10 }
 0x59a   : > { %1858 = vmatprep.subr.bf16.mxu0 %v1987_v3 }
 0x667   : > { %v711_v21 = vpop.f32.mrb[10].mxu0 }
 0x668   : > { %v715_v22 = vadd.f32 %v711_v21, %v367_v20  ;;  %v1740_v23 = vpop.f32.mrb[11].mxu0 }
 0x66a   : > { %1915 = vtanh.f32 %v715_v22  ;;  %v1610_v26 = vmul.f32 -1.442695, %v715_v22 }
 0x66c   : > { %1917 = vpow2.f32 %v1610_v26 }
 0x674   : > { %v1916_v24 = vpop.eup %1915 }
 0x675   : > { %725 = vrot.lane.b32.xlu0 %v1916_v24, %s1991_s17 }
 0x676   : > { %v1918_v27 = vpop.eup %1917 }
 0x677   : > { %v719_v28 = vadd.f32 1.0, %v1918_v27 }
 0x679   : > { %743 = vperm.xlu0 %1898, %v741_v25   ;;  %1919 = vrcp.f32 %v719_v28 }
 0x683   : > { %v1920_v29 = vpop.eup %1919 }
 0x684   : > { %v723_v33 = vmul.f32 %v1920_v29, %v637_v32 }
 0x6e7   : > { %v726_v30 = vpop.permute.xlu0 %725 }
 0x6e8   : > { %v728_v31 = vmul.f32 %v1920_v29, %v726_v30 }
 0x6ea   : > { %730 = vrot.lane.b32.xlu1 %v728_v31, %s1992_s20 }
 0x6f8   : > { %v744_v37 = vpop.permute.xlu0 %743 }
 0x6f9   : > { %vm745_vm8 = vcmp.eq.s32.totalorder %v744_v37, 1 }
 0x75c   : > { %v731_v34 = vpop.permute.xlu1 %730 }
 0x75d   : > { %v733_v35 = vadd.f32 %v731_v34, %v723_v33  ;;  %v382_v34 = vadd.f32 %v2144_v8, %v2099_v16 }
 0x75f   : > { %1921 = vtanh.f32 %v733_v35  ;;  %v747_v54 = vsel %vm745_vm8, %v733_v35, %v637_v32 }
 0x769   : > { %v1922_v36 = vpop.eup %1921 }
 0x76a   : > { %736 = vrot.lane.b32.xlu1 %v1922_v36, %s1991_s17 }
 0x7dc   : > { %v737_v38 = vpop.permute.xlu1 %736 }
 0x7dd   : > { %v739_v39 = vmul.f32 %v1920_v29, %v737_v38 }
 0x7df   : > { %v746_v40 = vsel %vm745_vm8, %v739_v39, %v636_v5  ;;  %v1071_v39 = vsel %vm1070_vm13, 1, %v1990_v13 }
 0x7e0   : > { %751 = vrot.lane.b32.xlu1 %v746_v40, %s1992_s20 }
 0x852   : > { %v752_v41 = vpop.permute.xlu1 %751 }
 0x853   : > { %1750 = vmatmul.mubr.msk.f32.vlgmr.msra.gmra.mrb[4].mxu1 %vm421_vm4, %v752_v41 }
 0x854   : > { %1854 = vmatpush3.bf16.msra.mxu1 %v2041_v4  ;;  %1771 = vmatprep.mubr.msk.f32.mxu1 %vm1988_vm0, %v1989_v9 }
 0x855   : > { %1855 = vmatprep.subr.bf16.mxu1 %v1987_v3 }
 0x858   : > { %1857 = vmatpush3.bf16.msra.mxu1 %v2057_v10 }
 0x859   : > { %1864 = vmatprep.subr.bf16.mxu1 %v1987_v3 }
 0x926   : > { %v821_v43 = vpop.f32.mrb[4].mxu1 }
 0x927   : > { %v825_v44 = vadd.f32 %v821_v43, %v372_v42  ;;  %v1751_v45 = vpop.f32.mrb[5].mxu1 }
 0x929   : > { %1923 = vtanh.f32 %v825_v44  ;;  %v1612_v48 = vmul.f32 -1.442695, %v825_v44 }
 0x92b   : > { %1925 = vpow2.f32 %v1612_v48 }
 0x933   : > { %v1924_v46 = vpop.eup %1923 }
 0x934   : > { %835 = vrot.lane.b32.xlu0 %v1924_v46, %s1991_s17 }
 0x935   : > { %v1926_v49 = vpop.eup %1925 }
 0x936   : > { %v829_v50 = vadd.f32 1.0, %v1926_v49 }
 0x938   : > { %853 = vperm.xlu0 %1898, %v851_v47   ;;  %1927 = vrcp.f32 %v829_v50 }
 0x942   : > { %v1928_v51 = vpop.eup %1927 }
 0x943   : > { %v833_v55 = vmul.f32 %v1928_v51, %v747_v54 }
 0x9a6   : > { %v836_v52 = vpop.permute.xlu0 %835 }
 0x9a7   : > { %v838_v53 = vmul.f32 %v1928_v51, %v836_v52 }
 0x9a9   : > { %840 = vrot.lane.b32.xlu1 %v838_v53, %s1992_s20 }
 0x9b7   : > { %v854_v59 = vpop.permute.xlu0 %853 }
 0x9b8   : > { %vm855_vm10 = vcmp.eq.s32.totalorder %v854_v59, 1 }
 0xa1b   : > { %v841_v56 = vpop.permute.xlu1 %840 }
 0xa1c   : > { %v843_v57 = vadd.f32 %v841_v56, %v833_v55  ;;  %v387_v55 = vadd.f32 %v2099_v16, %v2150_v15 }
 0xa1e   : > { %1929 = vtanh.f32 %v843_v57  ;;  %v857_v24 = vsel %vm855_vm10, %v843_v57, %v747_v54 }
 0xa28   : > { %v1930_v58 = vpop.eup %1929 }
 0xa29   : > { %846 = vrot.lane.b32.xlu1 %v1930_v58, %s1991_s17 }
 0xa9b   : > { %v847_v60 = vpop.permute.xlu1 %846 }
 0xa9c   : > { %v849_v61 = vmul.f32 %v1928_v51, %v847_v60  ;;  %v1181_v60 = vsel %vm1180_vm15, 1, %v1990_v13 }
 0xa9e   : > { %v856_v62 = vsel %vm855_vm10, %v849_v61, %v746_v40 }
 0xa9f   : > { %861 = vrot.lane.b32.xlu0 %v856_v62, %s1992_s20 }
 0xb11   : > { %v862_v63 = vpop.permute.xlu0 %861 }
 0xb12   : > { %1761 = vmatmul.mubr.msk.f32.vlgmr.msra.gmra.mrb[12].mxu0 %vm421_vm4, %v862_v63 }
 0xb13   : > { %1860 = vmatpush3.bf16.msra.mxu0 %v2041_v4  ;;  %1782 = vmatprep.mubr.msk.f32.mxu0 %vm1988_vm0, %v1989_v9 }
 0xb14   : > { %1861 = vmatprep.subr.bf16.mxu0 %v1987_v3 }
 0xb17   : > { %1863 = vmatpush3.bf16.msra.mxu0 %v2057_v10 }
 0xb18   : > { %1870 = vmatprep.subr.bf16.mxu0 %v1987_v3 }
 0xbe5   : > { %v931_v1 = vpop.f32.mrb[12].mxu0 }
 0xbe6   : > { %v935_v2 = vadd.f32 %v931_v1, %v377_v0  ;;  %v1762_v5 = vpop.f32.mrb[13].mxu0 }
 0xbe8   : > { %1931 = vtanh.f32 %v935_v2  ;;  %v1614_v19 = vmul.f32 -1.442695, %v935_v2 }
 0xbea   : > { %1933 = vpow2.f32 %v1614_v19 }
 0xbf2   : > { %v1932_v6 = vpop.eup %1931 }
 0xbf3   : > { %945 = vrot.lane.b32.xlu1 %v1932_v6, %s1991_s17 }
 0xbf4   : > { %v1934_v20 = vpop.eup %1933 }
 0xbf5   : > { %v939_v21 = vadd.f32 1.0, %v1934_v20 }
 0xbf7   : > { %963 = vperm.xlu1 %1897, %v961_v7   ;;  %1935 = vrcp.f32 %v939_v21 }
 0xc01   : > { %v1936_v22 = vpop.eup %1935 }
 0xc02   : > { %v943_v25 = vmul.f32 %v1936_v22, %v857_v24 }
 0xc65   : > { %v946_v23 = vpop.permute.xlu1 %945 }
 0xc66   : > { %v948_v11 = vmul.f32 %v1936_v22, %v946_v23 }
 0xc68   : > { %950 = vrot.lane.b32.xlu0 %v948_v11, %s1992_s20 }
 0xc76   : > { %v964_v29 = vpop.permute.xlu1 %963 }
 0xc77   : > { %vm965_vm12 = vcmp.eq.s32.totalorder %v964_v29, 1 }
 0xcda   : > { %v951_v26 = vpop.permute.xlu0 %950 }
 0xcdb   : > { %v953_v27 = vadd.f32 %v951_v26, %v943_v25 }
 0xcdd   : > { %1937 = vtanh.f32 %v953_v27  ;;  %v967_v45 = vsel %vm965_vm12, %v953_v27, %v857_v24  ;;  %v392_v24 = vadd.f32 %v2148_v12, %v2099_v16 }
 0xce7   : > { %v1938_v28 = vpop.eup %1937 }
 0xce8   : > { %956 = vrot.lane.b32.xlu0 %v1938_v28, %s1991_s17 }
 0xd5a   : > { %v957_v30 = vpop.permute.xlu0 %956 }
 0xd5b   : > { %v959_v31 = vmul.f32 %v1936_v22, %v957_v30 }
 0xd5d   : > { %v966_v32 = vsel %vm965_vm12, %v959_v31, %v856_v62 }
 0xd5e   : > { %971 = vrot.lane.b32.xlu1 %v966_v32, %s1992_s20 }
 0xdd0   : > { %v972_v33 = vpop.permute.xlu1 %971 }
 0xdd1   : > { %1772 = vmatmul.mubr.msk.f32.vlgmr.msra.gmra.mrb[6].mxu1 %vm421_vm4, %v972_v33 }
 0xdd2   : > { %1866 = vmatpush3.bf16.msra.mxu1 %v2041_v4  ;;  %1793 = vmatprep.mubr.msk.f32.mxu1 %vm1988_vm0, %v1989_v9 }
 0xdd3   : > { %1867 = vmatprep.subr.bf16.mxu1 %v1987_v3 }
 0xdd6   : > { %1869 = vmatpush3.bf16.msra.mxu1 %v2057_v10 }
 0xdd7   : > { %1876 = vmatprep.subr.bf16.mxu1 %v1987_v3 }
 0xea4   : > { %v1041_v35 = vpop.f32.mrb[6].mxu1 }
 0xea5   : > { %v1045_v36 = vadd.f32 %v1041_v35, %v382_v34  ;;  %v1773_v37 = vpop.f32.mrb[7].mxu1 }
 0xea7   : > { %1939 = vtanh.f32 %v1045_v36  ;;  %v1616_v40 = vmul.f32 -1.442695, %v1045_v36 }
 0xea9   : > { %1941 = vpow2.f32 %v1616_v40 }
 0xeb1   : > { %v1940_v38 = vpop.eup %1939 }
 0xeb2   : > { %1055 = vrot.lane.b32.xlu0 %v1940_v38, %s1991_s17 }
 0xeb3   : > { %v1942_v41 = vpop.eup %1941 }
 0xeb4   : > { %v1049_v42 = vadd.f32 1.0, %v1942_v41  ;;  %v397_v41 = vadd.f32 %v2099_v16, %v2154_v18 }
 0xeb6   : > { %1073 = vperm.xlu0 %1898, %v1071_v39   ;;  %1943 = vrcp.f32 %v1049_v42 }
 0xec0   : > { %v1944_v43 = vpop.eup %1943 }
 0xec1   : > { %v1053_v46 = vmul.f32 %v1944_v43, %v967_v45 }
 0xf24   : > { %v1056_v44 = vpop.permute.xlu0 %1055 }
 0xf25   : > { %v1058_v8 = vmul.f32 %v1944_v43, %v1056_v44 }
 0xf27   : > { %1060 = vrot.lane.b32.xlu1 %v1058_v8, %s1992_s20 }
 0xf35   : > { %v1074_v50 = vpop.permute.xlu0 %1073 }
 0xf36   : > { %vm1075_vm14 = vcmp.eq.s32.totalorder %v1074_v50, 1 }
 0xf99   : > { %v1061_v47 = vpop.permute.xlu1 %1060 }
 0xf9a   : > { %v1063_v48 = vadd.f32 %v1061_v47, %v1053_v46 }
 0xf9c   : > { %1945 = vtanh.f32 %v1063_v48  ;;  %v1077_v2 = vsel %vm1075_vm14, %v1063_v48, %v967_v45  ;;  %v1401_v45 = vsel %vm1400_vm3, 1, %v1990_v13 }
 0xfa6   : > { %v1946_v49 = vpop.eup %1945 }
 0xfa7   : > { %1066 = vrot.lane.b32.xlu1 %v1946_v49, %s1991_s17 }
0x1019   : > { %v1067_v51 = vpop.permute.xlu1 %1066 }
0x101a   : > { %v1069_v52 = vmul.f32 %v1944_v43, %v1067_v51 }
0x101c   : > { %v1076_v53 = vsel %vm1075_vm14, %v1069_v52, %v966_v32 }
0x101d   : > { %1081 = vrot.lane.b32.xlu0 %v1076_v53, %s1992_s20 }
0x108f   : > { %v1082_v54 = vpop.permute.xlu0 %1081 }
0x1090   : > { %1783 = vmatmul.mubr.msk.f32.vlgmr.msra.gmra.mrb[14].mxu0 %vm421_vm4, %v1082_v54 }
0x1091   : > { %1872 = vmatpush3.bf16.msra.mxu0 %v2041_v4  ;;  %1804 = vmatprep.mubr.msk.f32.mxu0 %vm1988_vm0, %v1989_v9 }
0x1092   : > { %1873 = vmatprep.subr.bf16.mxu0 %v1987_v3 }
0x1095   : > { %1875 = vmatpush3.bf16.msra.mxu0 %v2057_v10 }
0x1163   : > { %v1151_v56 = vpop.f32.mrb[14].mxu0 }
0x1164   : > { %v1155_v57 = vadd.f32 %v1151_v56, %v387_v55  ;;  %v1784_v58 = vpop.f32.mrb[15].mxu0 }
0x1166   : > { %1947 = vtanh.f32 %v1155_v57  ;;  %v1618_v61 = vmul.f32 -1.442695, %v1155_v57 }
0x1168   : > { %1949 = vpow2.f32 %v1618_v61  ;;  %v402_v61 = vadd.f32 %v2152_v17, %v2099_v16 }
0x1170   : > { %v1948_v59 = vpop.eup %1947 }
0x1171   : > { %1165 = vrot.lane.b32.xlu1 %v1948_v59, %s1991_s17 }
0x1172   : > { %v1950_v62 = vpop.eup %1949 }
0x1173   : > { %v1159_v63 = vadd.f32 1.0, %v1950_v62 }
0x1175   : > { %1183 = vperm.xlu1 %1897, %v1181_v60   ;;  %1951 = vrcp.f32 %v1159_v63 }
0x117f   : > { %v1952_v0 = vpop.eup %1951 }
0x1180   : > { %v1163_v5 = vmul.f32 %v1952_v0, %v1077_v2 }
0x11e3   : > { %v1166_v1 = vpop.permute.xlu1 %1165 }
0x11e4   : > { %v1168_v15 = vmul.f32 %v1952_v0, %v1166_v1 }
0x11e6   : > { %1170 = vrot.lane.b32.xlu0 %v1168_v15, %s1992_s20  ;;  %v1511_v15 = vsel %vm1510_vm6, 1, %v1990_v13 }
0x11f4   : > { %v1184_v20 = vpop.permute.xlu1 %1183 }
0x11f5   : > { %vm1185_vm1 = vcmp.eq.s32.totalorder %v1184_v20, 1 }
0x1258   : > { %v1171_v6 = vpop.permute.xlu0 %1170 }
0x1259   : > { %v1173_v7 = vadd.f32 %v1171_v6, %v1163_v5 }
0x125b   : > { %1953 = vtanh.f32 %v1173_v7  ;;  %v1187_v31 = vsel %vm1185_vm1, %v1173_v7, %v1077_v2 }
0x1265   : > { %v1954_v19 = vpop.eup %1953 }
0x1266   : > { %1176 = vrot.lane.b32.xlu0 %v1954_v19, %s1991_s17 }
0x12d8   : > { %v1177_v21 = vpop.permute.xlu0 %1176 }
0x12d9   : > { %v1179_v22 = vmul.f32 %v1952_v0, %v1177_v21 }
0x12db   : > { %v1186_v23 = vsel %vm1185_vm1, %v1179_v22, %v1076_v53 }
0x12dc   : > { %1191 = vrot.lane.b32.xlu1 %v1186_v23, %s1992_s20 }
0x134e   : > { %v1192_v11 = vpop.permute.xlu1 %1191 }
0x134f   : > { %1794 = vmatmul.mubr.msk.f32.vlgmr.msra.gmra.mrb[8].mxu1 %vm421_vm4, %v1192_v11 }
0x1350   : > { %1878 = vmatpush3.bf16.msra.mxu1 %v2041_v4  ;;  %1815 = vmatprep.mubr.msk.f32.mxu1 %vm1988_vm0, %v1989_v9  ;;  %v1291_v4 = vsel %vm1290_vm2, 1, %v1990_v13 }
0x1351   : > { %1879 = vmatprep.subr.bf16.mxu1 %v1987_v3 }
0x1354   : > { %1881 = vmatpush3.bf16.msra.mxu1 %v2057_v10 }
0x1422   : > { %v1261_v25 = vpop.f32.mrb[8].mxu1 }
0x1423   : > { %v1265_v26 = vadd.f32 %v1261_v25, %v392_v24  ;;  %v1795_v27 = vpop.f32.mrb[9].mxu1 }
0x1425   : > { %1955 = vtanh.f32 %v1265_v26  ;;  %v1620_v9 = vmul.f32 -1.442695, %v1265_v26 }
0x1427   : > { %1957 = vpow2.f32 %v1620_v9 }
0x142f   : > { %v1956_v28 = vpop.eup %1955 }
0x1430   : > { %1275 = vrot.lane.b32.xlu0 %v1956_v28, %s1991_s17 }
0x1431   : > { %v1958_v3 = vpop.eup %1957 }
0x1432   : > { %v1269_v29 = vadd.f32 1.0, %v1958_v3 }
0x1434   : > { %1293 = vperm.xlu0 %1898, %v1291_v4   ;;  %1959 = vrcp.f32 %v1269_v29 }
0x143e   : > { %v1960_v10 = vpop.eup %1959 }
0x143f   : > { %v1273_v32 = vmul.f32 %v1960_v10, %v1187_v31 }
0x14a2   : > { %v1276_v30 = vpop.permute.xlu0 %1275 }
0x14a3   : > { %v1278_v12 = vmul.f32 %v1960_v10, %v1276_v30 }
0x14a5   : > { %1280 = vrot.lane.b32.xlu1 %v1278_v12, %s1992_s20 }
0x14b3   : > { %v1294_v36 = vpop.permute.xlu0 %1293 }
0x14b4   : > { %vm1295_vm0 = vcmp.eq.s32.totalorder %v1294_v36, 1 }
0x1517   : > { %v1281_v33 = vpop.permute.xlu1 %1280 }
0x1518   : > { %v1283_v34 = vadd.f32 %v1281_v33, %v1273_v32 }
0x151a   : > { %1961 = vtanh.f32 %v1283_v34  ;;  %v1297_v51 = vsel %vm1295_vm0, %v1283_v34, %v1187_v31 }
0x1524   : > { %v1962_v35 = vpop.eup %1961 }
0x1525   : > { %1286 = vrot.lane.b32.xlu1 %v1962_v35, %s1991_s17 }
0x1597   : > { %v1287_v37 = vpop.permute.xlu1 %1286 }
0x1598   : > { %v1289_v38 = vmul.f32 %v1960_v10, %v1287_v37 }
0x159a   : > { %v1296_v39 = vsel %vm1295_vm0, %v1289_v38, %v1186_v23 }
0x159b   : > { %1301 = vrot.lane.b32.xlu0 %v1296_v39, %s1992_s20 }
0x160d   : > { %v1302_v40 = vpop.permute.xlu0 %1301 }
0x160e   : > { %1805 = vmatmul.mubr.msk.f32.vlgmr.msra.gmra.mrb[16].mxu0 %vm421_vm4, %v1302_v40 }
0x16e1   : > { %v1371_v42 = vpop.f32.mrb[16].mxu0 }
0x16e2   : > { %v1375_v43 = vadd.f32 %v1371_v42, %v397_v41  ;;  %v1806_v44 = vpop.f32.mrb[17].mxu0 }
0x16e4   : > { %1963 = vtanh.f32 %v1375_v43  ;;  %v1622_v46 = vmul.f32 -1.442695, %v1375_v43 }
0x16e6   : > { %1965 = vpow2.f32 %v1622_v46 }
0x16ee   : > { %v1964_v8 = vpop.eup %1963 }
0x16ef   : > { %1385 = vrot.lane.b32.xlu1 %v1964_v8, %s1991_s17 }
0x16f0   : > { %v1966_v47 = vpop.eup %1965 }
0x16f1   : > { %v1379_v48 = vadd.f32 1.0, %v1966_v47 }
0x16f3   : > { %1403 = vperm.xlu1 %1897, %v1401_v45   ;;  %1967 = vrcp.f32 %v1379_v48 }
0x16fd   : > { %v1968_v49 = vpop.eup %1967 }
0x16fe   : > { %v1383_v52 = vmul.f32 %v1968_v49, %v1297_v51 }
0x1761   : > { %v1386_v50 = vpop.permute.xlu1 %1385 }
0x1762   : > { %v1388_v18 = vmul.f32 %v1968_v49, %v1386_v50 }
0x1764   : > { %1390 = vrot.lane.b32.xlu0 %v1388_v18, %s1992_s20 }
0x1772   : > { %v1404_v56 = vpop.permute.xlu1 %1403 }
0x1773   : > { %vm1405_vm5 = vcmp.eq.s32.totalorder %v1404_v56, 1 }
0x17d6   : > { %v1391_v53 = vpop.permute.xlu0 %1390 }
0x17d7   : > { %v1393_v54 = vadd.f32 %v1391_v53, %v1383_v52 }
0x17d9   : > { %1969 = vtanh.f32 %v1393_v54  ;;  %v1407_v17 = vsel %vm1405_vm5, %v1393_v54, %v1297_v51 }
0x17e3   : > { %v1970_v55 = vpop.eup %1969 }
0x17e4   : > { %1396 = vrot.lane.b32.xlu0 %v1970_v55, %s1991_s17 }
0x1856   : > { %v1397_v57 = vpop.permute.xlu0 %1396 }
0x1857   : > { %v1399_v58 = vmul.f32 %v1968_v49, %v1397_v57 }
0x1859   : > { %v1406_v59 = vsel %vm1405_vm5, %v1399_v58, %v1296_v39 }
0x185a   : > { %1411 = vrot.lane.b32.xlu1 %v1406_v59, %s1992_s20 }
0x18cc   : > { %v1412_v60 = vpop.permute.xlu1 %1411 }
0x18cd   : > { %1816 = vmatmul.mubr.msk.f32.vlgmr.msra.gmra.mrb[10].mxu1 %vm421_vm4, %v1412_v60 }
0x19a0   : > { %v1481_v62 = vpop.f32.mrb[10].mxu1 }
0x19a1   : > { %v1485_v63 = vadd.f32 %v1481_v62, %v402_v61  ;;  %v1817_v0 = vpop.f32.mrb[11].mxu1 }
0x19a3   : > { %1971 = vtanh.f32 %v1485_v63  ;;  %v1624_v2 = vmul.f32 -1.442695, %v1485_v63 }
0x19a5   : > { %1973 = vpow2.f32 %v1624_v2 }
0x19ad   : > { %v1972_v1 = vpop.eup %1971 }
0x19ae   : > { %1495 = vrot.lane.b32.xlu0 %v1972_v1, %s1991_s17 }
0x19af   : > { %v1974_v5 = vpop.eup %1973 }
0x19b0   : > { %v1489_v6 = vadd.f32 1.0, %v1974_v5 }
0x19b2   : > { %1513 = vperm.xlu0 %1898, %v1511_v15   ;;  %1975 = vrcp.f32 %v1489_v6 }
0x19bc   : > { %v1976_v7 = vpop.eup %1975 }
0x19bd   : > { %v1493_v14 = vmul.f32 %v1976_v7, %v1407_v17 }
0x1a20   : > { %v1496_v19 = vpop.permute.xlu0 %1495 }
0x1a21   : > { %v1498_v16 = vmul.f32 %v1976_v7, %v1496_v19 }
0x1a23   : > { %1500 = vrot.lane.b32.xlu1 %v1498_v16, %s1992_s20 }
0x1a31   : > { %v1514_v13 = vpop.permute.xlu0 %1513 }
0x1a32   : > { %vm1515_vm7 = vcmp.eq.s32.totalorder %v1514_v13, 1 }
0x1a95   : > { %v1501_v20 = vpop.permute.xlu1 %1500 }
0x1a96   : > { %v1503_v21 = vadd.f32 %v1501_v20, %v1493_v14 }
0x1a98   : > { %1977 = vtanh.f32 %v1503_v21 }
0x1aa2   : > { %v1978_v22 = vpop.eup %1977 }
0x1aa3   : > { %1506 = vrot.lane.b32.xlu1 %v1978_v22, %s1991_s17 }
0x1b15   : > { %v1507_v23 = vpop.permute.xlu1 %1506 }
0x1b16   : > { %v1509_v11 = vmul.f32 %v1976_v7, %v1507_v23 }
0x1b18   : > { %v1516_v24 = vsel %vm1515_vm7, %v1509_v11, %v1406_v59 }
0x1b19   : > { %1518 = vrot.lane.b32.xlu0 %v1516_v24, %s1992_s20 }
0x1b8b   : > { %v1519_v25 = vpop.permute.xlu0 %1518 }
0x1b8c   : > { %1521 = vst.msk [vmem:[%s239_s23] sm:$0xff] %vm421_vm4, %v1519_v25 }
0x1b8d PF: > { %s15_s18 = sadd.s32 1, %s1985_s18  }
0x1b8e   : > { %p12_p4 = scmp.ge.s32.totalorder %s15_s18, 4  }
0x1b90   :  { %14 = sbr.rel (!%p12_p4) target bundleno = 1 (0x1), region = 82 }

</bundles_post_ra>
